<compile_context>
chip_gen: v7x
topology: tpu7x:2x2x1
jax: 0.10.0
libtpu: 0.0.40
codegen_flags: <defaults>
</compile_context>

<pallas_src>
import math
from typing import NamedTuple

import jax
import jax.numpy as jnp
from jax.experimental import pallas as pl
from jax.experimental.pallas import tpu as pltpu

LANE = 128
SUBLANE = 8


def _round_up(x, m):
    return ((x + m - 1) // m) * m


def _vmem_cap_bytes():
    """Generation-aware VMEM ceiling (v7x: ~56 MiB, v5e/v6e: up to ~120 MiB)."""
    try:
        phys = int(pltpu.get_tpu_info().vmem_capacity_bytes)
    except Exception:
        phys = 64 * 2 ** 20  # conservative default that fits every generation
    return min(phys - 8 * 2 ** 20, 120 * 2 ** 20)


# ---------------------------------------------------------------------------
# Kernel.  grid = (batch_tiles, hidden_chunks)
#   batch axis  -> "parallel"  (megacore sharding on v7x)
#   hidden axis -> "arbitrary" (reduction; accumulate into f32 VMEM scratch)
# ---------------------------------------------------------------------------
def _mlp_kernel(x_ref, w1_ref, b1_ref, w2_ref, b2_ref, o_ref, acc_ref):
    k = pl.program_id(1)

    x = x_ref[...].astype(w1_ref.dtype)                       # cast in VMEM, not HBM
    h = jnp.dot(x, w1_ref[...], preferred_element_type=jnp.float32)
    h = jnp.maximum(h + b1_ref[...], 0.0)                     # bias + ReLU in f32
    part = jnp.dot(h.astype(w2_ref.dtype), w2_ref[...],
                   preferred_element_type=jnp.float32)

    @pl.when(k == 0)
    def _init():
        acc_ref[...] = part

    @pl.when(k > 0)
    def _accumulate():
        acc_ref[...] += part

    @pl.when(k == pl.num_programs(1) - 1)
    def _finalize():
        o_ref[...] = (acc_ref[...] + b2_ref[...]).astype(o_ref.dtype)


# ---------------------------------------------------------------------------
# Parameter preparation (do once, cache, reuse across forward calls).
# ---------------------------------------------------------------------------
class MLPParams(NamedTuple):
    w1: jax.Array          # (input_dim, hid_p)   matmul dtype
    b1: jax.Array          # (1, hid_p)           float32
    w2: jax.Array          # (hid_p, output_dim)  matmul dtype
    b2: jax.Array          # (1, output_dim)      float32
    input_dim: int
    hidden_dim: int
    output_dim: int


def prepare_mlp_params(w1, b1, w2, b2, *, matmul_dtype=None):
    """Pad the hidden axis to a lane multiple and convert dtypes, once.

    Zero padding is exact: padded hidden units are relu(0 + 0) = 0 and the
    corresponding rows of w2 are zero, so they contribute nothing.
    """
    input_dim, hidden_dim = w1.shape
    output_dim = w2.shape[1]
    mdt = jnp.dtype(matmul_dtype) if matmul_dtype is not None else jnp.dtype(w1.dtype)
    hid_p = _round_up(hidden_dim, LANE)

    if hid_p == hidden_dim:
        w1p = w1.astype(mdt)
        w2p = w2.astype(mdt)
        b1p = b1.reshape(1, -1).astype(jnp.float32)
    else:
        w1p = jnp.zeros((input_dim, hid_p), mdt).at[:, :hidden_dim].set(w1.astype(mdt))
        w2p = jnp.zeros((hid_p, output_dim), mdt).at[:hidden_dim, :].set(w2.astype(mdt))
        b1p = jnp.zeros((1, hid_p), jnp.float32).at[:, :hidden_dim].set(
            b1.reshape(1, -1).astype(jnp.float32))
    b2p = b2.reshape(1, -1).astype(jnp.float32)
    return MLPParams(w1p, b1p, w2p, b2p, input_dim, hidden_dim, output_dim)


# ---------------------------------------------------------------------------
# Forward pass.
# ---------------------------------------------------------------------------
def mlp_forward_prepared(x, params, *, block_batch=None, hidden_chunk=512):
    """relu(x @ W1 + b1) @ W2 + b2 using pre-prepared (padded) parameters."""
    B, input_dim = x.shape
    assert input_dim == params.input_dim, (input_dim, params.input_dim)
    hid_p = params.w1.shape[1]
    output_dim = params.output_dim
    out_dtype = x.dtype

    # ---- hidden-axis chunk (lane-aligned, divides hid_p) ---------------------
    chunk = min(_round_up(max(hidden_chunk, LANE), LANE), hid_p)
    while hid_p % chunk:
        chunk -= LANE
    num_chunks = hid_p // chunk

    # ---- batch tile -----------------------------------------------------------
    if block_batch is None:
        block_batch = 2048                       # big tiles: amortize per-step overhead
    block_batch = min(block_batch, _round_up(B, SUBLANE))
    if B >= 2 * SUBLANE:
        # keep >= 2 batch steps so v7x's second TensorCore gets work
        block_batch = min(block_batch, _round_up((B + 1) // 2, SUBLANE))
    block_batch = max(SUBLANE, _round_up(block_batch, SUBLANE))

    # ---- VMEM budget (shrink the batch tile if it would overflow) ------------
    x_item = jnp.dtype(x.dtype).itemsize
    w_item = jnp.dtype(params.w1.dtype).itemsize
    o_item = jnp.dtype(out_dtype).itemsize
    cap = _vmem_cap_bytes()

    def vmem_needed(bb):
        return (2 * bb * input_dim * x_item            # double-buffered x tiles
                + 2 * input_dim * chunk * w_item       # W1 tiles
                + 2 * chunk * 4                        # b1 tiles (f32)
                + 2 * chunk * output_dim * w_item      # W2 tiles
                + 2 * output_dim * 4                   # b2 (f32)
                + 2 * bb * output_dim * o_item         # double-buffered out tiles
                + bb * output_dim * 4                  # f32 accumulator scratch
                + bb * chunk * 4)                      # f32 hidden intermediate

    while vmem_needed(block_batch) > cap and block_batch > SUBLANE:
        block_batch = max(SUBLANE, _round_up(block_batch // 2, SUBLANE))

    # ---- batch padding only when needed (no lane padding of x / output) ------
    Bp = _round_up(B, block_batch)
    xp = x if Bp == B else jnp.pad(x, ((0, Bp - B), (0, 0)))

    grid = (Bp // block_batch, num_chunks)

    cost = pl.CostEstimate(
        flops=2 * Bp * hid_p * (input_dim + output_dim),
        transcendentals=0,
        bytes_accessed=int(xp.size * x_item
                           + params.w1.size * w_item + params.w2.size * w_item
                           + params.b1.size * 4 + params.b2.size * 4
                           + Bp * output_dim * o_item),
    )
    vmem_limit = int(min(max(int(vmem_needed(block_batch) * 1.5), 32 * 2 ** 20), cap))

    out = pl.pallas_call(
        _mlp_kernel,
        out_shape=jax.ShapeDtypeStruct((Bp, output_dim), out_dtype),
        grid_spec=pltpu.PrefetchScalarGridSpec(
            num_scalar_prefetch=0,
            grid=grid,
            in_specs=[
                pl.BlockSpec((block_batch, input_dim), lambda i, k: (i, 0)),  # x tile
                pl.BlockSpec((input_dim, chunk), lambda i, k: (0, k)),        # W1 chunk
                pl.BlockSpec((1, chunk), lambda i, k: (0, k)),                # b1 chunk (f32)
                pl.BlockSpec((chunk, output_dim), lambda i, k: (k, 0)),       # W2 chunk
                pl.BlockSpec((1, output_dim), lambda i, k: (0, 0)),           # b2 (f32)
            ],
            out_specs=pl.BlockSpec((block_batch, output_dim), lambda i, k: (i, 0)),
            scratch_shapes=[pltpu.VMEM((block_batch, output_dim), jnp.float32)],
        ),
        compiler_params=pltpu.CompilerParams(
            dimension_semantics=("parallel", "arbitrary"),
            vmem_limit_bytes=vmem_limit,
        ),
        cost_estimate=cost,
    )(xp, params.w1, params.b1, params.w2, params.b2)

    return out if Bp == B else out[:B]


def mlp_forward(x, w1, b1, w2, b2, *, block_batch=None, hidden_chunk=512,
                matmul_dtype=None):
    """Convenience one-shot wrapper (prefer prepare_mlp_params + mlp_forward_prepared
    when calling the MLP repeatedly, so weight padding/conversion is not redone)."""
    params = prepare_mlp_params(w1, b1, w2, b2, matmul_dtype=matmul_dtype)
    return mlp_forward_prepared(x, params, block_batch=block_batch,
                                hidden_chunk=hidden_chunk)


def init_mlp_params(key, input_dim, output_dim, hidden_dim=256, dtype=jnp.float32):
    """Deterministic PyTorch-style (Kaiming-uniform) init; weights stored (in, out)."""
    k1, k2, k3, k4 = jax.random.split(key, 4)
    bound1 = 1.0 / math.sqrt(input_dim)
    bound2 = 1.0 / math.sqrt(hidden_dim)
    w1 = jax.random.uniform(k1, (input_dim, hidden_dim), jnp.float32, -bound1, bound1).astype(dtype)
    b1 = jax.random.uniform(k2, (1, hidden_dim), jnp.float32, -bound1, bound1).astype(dtype)
    w2 = jax.random.uniform(k3, (hidden_dim, output_dim), jnp.float32, -bound2, bound2).astype(dtype)
    b2 = jax.random.uniform(k4, (1, output_dim), jnp.float32, -bound2, bound2).astype(dtype)
    return w1, b1, w2, b2


if __name__ == "__main__":
    key = jax.random.PRNGKey(0)
    kx, kp, kx2, kp2 = jax.random.split(key, 4)

    # --- Test 1: small f32 MLP, single hidden chunk (exact vs pure-JAX ref) ----
    batch, input_dim, hidden_dim, output_dim = 8, 16, 32, 16
    x = jax.random.normal(kx, (batch, input_dim), jnp.float32)
    w1, b1, w2, b2 = init_mlp_params(kp, input_dim, output_dim, hidden_dim,
                                     dtype=jnp.float32)
    params = prepare_mlp_params(w1, b1, w2, b2)       # pad/convert once, reuse
    out = jax.block_until_ready(mlp_forward_prepared(x, params))
    ref = jnp.maximum(x @ w1 + b1, 0.0) @ w2 + b2
    assert out.shape == (batch, output_dim)
    assert jnp.allclose(out, ref, atol=1e-5, rtol=1e-5)

    # --- Test 2: bf16 params, batch tiling (grid > 1) + grid-tiled hidden axis -
    batch2, input_dim2, hidden_dim2, output_dim2 = 300, 40, 256, 24
    x2 = jax.random.normal(kx2, (batch2, input_dim2), jnp.float32)
    w1b, b1b, w2b, b2b = init_mlp_params(kp2, input_dim2, output_dim2, hidden_dim2,
                                         dtype=jnp.bfloat16)
    params2 = prepare_mlp_params(w1b, b1b, w2b, b2b)
    out2 = jax.block_until_ready(
        mlp_forward_prepared(x2, params2, block_batch=128, hidden_chunk=128))
    ref2 = (jnp.maximum(x2.astype(jnp.float32) @ w1b.astype(jnp.float32)
                        + b1b.astype(jnp.float32), 0.0)
            @ w2b.astype(jnp.float32) + b2b.astype(jnp.float32))
    assert out2.shape == (batch2, output_dim2)
    assert jnp.allclose(out2.astype(jnp.float32), ref2, atol=3e-2, rtol=3e-2)

    print("KERNEL_OK")
</pallas_src>

<mosaic_0001>
module attributes {stable_mosaic.version = 11 : i64} {
  func.func @_mlp_kernel(%arg0: i32, %arg1: i32, %arg2: memref<8x16xf32, #tpu.memory_space<vmem>>, %arg3: memref<16x128xf32, #tpu.memory_space<vmem>>, %arg4: memref<1x128xf32, #tpu.memory_space<vmem>>, %arg5: memref<128x16xf32, #tpu.memory_space<vmem>>, %arg6: memref<1x16xf32, #tpu.memory_space<vmem>>, %arg7: memref<8x16xf32, #tpu.memory_space<vmem>>, %arg8: memref<8x16xf32, #tpu.memory_space<vmem>>) attributes {dimension_semantics = [#tpu.dimension_semantics<parallel>, #tpu.dimension_semantics<arbitrary>], iteration_bounds = array<i64: 1, 1>, scalar_prefetch = 0 : i64, scratch_operands = 1 : i64, tpu.core_type = #tpu.core_type<tc>, window_params = [{transform_indices = @transform_0, window_bounds = array<i64: 8, 16>}, {transform_indices = @transform_1, window_bounds = array<i64: 16, 128>}, {transform_indices = @transform_2, window_bounds = array<i64: 1, 128>}, {transform_indices = @transform_3, window_bounds = array<i64: 128, 16>}, {pipeline_mode = #tpu.pipeline_mode<synchronous>, transform_indices = @transform_4, window_bounds = array<i64: 1, 16>}, {transform_indices = @transform_5, window_bounds = array<i64: 8, 16>}]} {
    %c0 = arith.constant 0 : index
    %c0_0 = arith.constant 0 : index
    %0 = vector.load %arg2[%c0, %c0_0] : memref<8x16xf32, #tpu.memory_space<vmem>>, vector<8x16xf32>
    %c0_1 = arith.constant 0 : index
    %c0_2 = arith.constant 0 : index
    %1 = vector.load %arg3[%c0_1, %c0_2] : memref<16x128xf32, #tpu.memory_space<vmem>>, vector<16x128xf32>
    %cst = arith.constant dense<0.000000e+00> : vector<8x128xf32>
    %2 = tpu.matmul %0, %1, %cst {dimension_numbers = #tpu.dot_dimension_numbers<[1], [0], [0], [1], [0, 0, 1, 1], [], []>} : vector<8x16xf32>, vector<16x128xf32>, vector<8x128xf32> -> vector<8x128xf32>
    %c0_3 = arith.constant 0 : index
    %c0_4 = arith.constant 0 : index
    %3 = vector.load %arg4[%c0_3, %c0_4] : memref<1x128xf32, #tpu.memory_space<vmem>>, vector<1x128xf32>
    %4 = vector.broadcast %3 : vector<1x128xf32> to vector<8x128xf32>
    %5 = arith.addf %2, %4 : vector<8x128xf32>
    %cst_5 = arith.constant 0.000000e+00 : f32
    %6 = vector.broadcast %cst_5 : f32 to vector<8x128xf32>
    %7 = arith.maximumf %5, %6 : vector<8x128xf32>
    %c0_6 = arith.constant 0 : index
    %c0_7 = arith.constant 0 : index
    %8 = vector.load %arg5[%c0_6, %c0_7] : memref<128x16xf32, #tpu.memory_space<vmem>>, vector<128x16xf32>
    %cst_8 = arith.constant dense<0.000000e+00> : vector<8x16xf32>
    %9 = tpu.matmul %7, %8, %cst_8 {dimension_numbers = #tpu.dot_dimension_numbers<[1], [0], [0], [1], [0, 0, 1, 1], [], []>} : vector<8x128xf32>, vector<128x16xf32>, vector<8x16xf32> -> vector<8x16xf32>
    %c0_i32 = arith.constant 0 : i32
    %10 = arith.cmpi eq, %arg1, %c0_i32 : i32
    %11 = arith.extui %10 : i1 to i32
    %c0_i32_9 = arith.constant 0 : i32
    %12 = arith.cmpi ne, %11, %c0_i32_9 : i32
    scf.if %12 {
      %c0_14 = arith.constant 0 : index
      %c0_15 = arith.constant 0 : index
      %19 = vector.load %arg8[%c0_14, %c0_15] : memref<8x16xf32, #tpu.memory_space<vmem>>, vector<8x16xf32>
      tpu.vector_store %arg8[%c0_14, %c0_15], %9 {strides = array<i32>} : memref<8x16xf32, #tpu.memory_space<vmem>>, vector<8x16xf32>,
    } else {
    }
    %c0_i32_10 = arith.constant 0 : i32
    %13 = arith.cmpi sgt, %arg1, %c0_i32_10 : i32
    %14 = arith.extui %13 : i1 to i32
    %c0_i32_11 = arith.constant 0 : i32
    %15 = arith.cmpi ne, %14, %c0_i32_11 : i32
    scf.if %15 {
      %c0_14 = arith.constant 0 : index
      %c0_15 = arith.constant 0 : index
      %19 = vector.load %arg8[%c0_14, %c0_15] : memref<8x16xf32, #tpu.memory_space<vmem>>, vector<8x16xf32>
      %20 = arith.addf %19, %9 : vector<8x16xf32>
      %c0_16 = arith.constant 0 : index
      %c0_17 = arith.constant 0 : index
      %21 = vector.load %arg8[%c0_16, %c0_17] : memref<8x16xf32, #tpu.memory_space<vmem>>, vector<8x16xf32>
      tpu.vector_store %arg8[%c0_16, %c0_17], %20 {strides = array<i32>} : memref<8x16xf32, #tpu.memory_space<vmem>>, vector<8x16xf32>,
    } else {
    }
    %c0_i32_12 = arith.constant 0 : i32
    %16 = arith.cmpi eq, %arg1, %c0_i32_12 : i32
    %17 = arith.extui %16 : i1 to i32
    %c0_i32_13 = arith.constant 0 : i32
    %18 = arith.cmpi ne, %17, %c0_i32_13 : i32
    scf.if %18 {
      %c0_14 = arith.constant 0 : index
      %c0_15 = arith.constant 0 : index
      %19 = vector.load %arg8[%c0_14, %c0_15] : memref<8x16xf32, #tpu.memory_space<vmem>>, vector<8x16xf32>
      %c0_16 = arith.constant 0 : index
      %c0_17 = arith.constant 0 : index
      %20 = vector.load %arg6[%c0_16, %c0_17] : memref<1x16xf32, #tpu.memory_space<vmem>>, vector<1x16xf32>
      %21 = vector.broadcast %20 : vector<1x16xf32> to vector<8x16xf32>
      %22 = arith.addf %19, %21 : vector<8x16xf32>
      %c0_18 = arith.constant 0 : index
      %c0_19 = arith.constant 0 : index
      %23 = vector.load %arg7[%c0_18, %c0_19] : memref<8x16xf32, #tpu.memory_space<vmem>>, vector<8x16xf32>
      tpu.vector_store %arg7[%c0_18, %c0_19], %22 {strides = array<i32>} : memref<8x16xf32, #tpu.memory_space<vmem>>, vector<8x16xf32>,
    } else {
    }
    return
  }
  func.func @transform_0(%arg0: i32, %arg1: i32) -> (i32, i32) {
    %c0_i32 = arith.constant 0 : i32
    %c0_i32_0 = arith.constant 0 : i32
    return %arg0, %c0_i32 : i32, i32
  }
  func.func @transform_1(%arg0: i32, %arg1: i32) -> (i32, i32) {
    %c0_i32 = arith.constant 0 : i32
    %c0_i32_0 = arith.constant 0 : i32
    return %c0_i32, %arg1 : i32, i32
  }
  func.func @transform_2(%arg0: i32, %arg1: i32) -> (i32, i32) {
    %c0_i32 = arith.constant 0 : i32
    %c0_i32_0 = arith.constant 0 : i32
    return %c0_i32, %arg1 : i32, i32
  }
  func.func @transform_3(%arg0: i32, %arg1: i32) -> (i32, i32) {
    %c0_i32 = arith.constant 0 : i32
    %c0_i32_0 = arith.constant 0 : i32
    return %arg1, %c0_i32 : i32, i32
  }
  func.func @transform_4(%arg0: i32, %arg1: i32) -> (i32, i32) {
    %c0_i32 = arith.constant 0 : i32
    %c0_i32_0 = arith.constant 0 : i32
    %c0_i32_1 = arith.constant 0 : i32
    return %c0_i32, %c0_i32_0 : i32, i32
  }
  func.func @transform_5(%arg0: i32, %arg1: i32) -> (i32, i32) {
    %c0_i32 = arith.constant 0 : i32
    %c0_i32_0 = arith.constant 0 : i32
    return %arg0, %c0_i32 : i32, i32
  }
}

</mosaic_0001>

<bundles_post_ra>
// kernel: tpu_custom_call.1
= control target key start
LH: loop header
LB: loop body
LE: loop exit
PB: predicated region body
PF: predicated region fallthrough
CT: control target
= control target key end

     0   :  { %v351_v2 = vmov 0.0|0.0   ;;  %vm352_vm0 = vmmov 0   ;;  %v353_v4 = vmov 0.0   ;;  %vm31_vm1 = vcmask 130048   ;;  %s463_s0 = inlined_call_operand.vmem [shape: f32[8,16], index: 0, kind: input, shape index: {}]   ;;  %s464_s1 = inlined_call_operand.vmem [shape: f32[16,128], index: 1, kind: input, shape index: {}]   ;;  %s465_s2 = inlined_call_operand.vmem [shape: f32[1,128], index: 2, kind: input, shape index: {}]   ;;  %s466_s3 = inlined_call_operand.vmem [shape: f32[128,16], index: 3, kind: input, shape index: {}]   ;;  %s467_s4 = inlined_call_operand.vmem [shape: f32[1,16], index: 4, kind: input, shape index: {}]   ;;  %s468_s5 = inlined_call_operand.hbm [shape: f32[8,16], index: 5, kind: output, shape index: {}]  }
   0x1   :  { %v22_v0 = vld [vmem:[%s464_s1] sm:$0xff]  ;;  %v23_v1 = vld [vmem:[%s464_s1 + $0x8] sm:$0xff]  ;;  %296 = vmatprep.subr.bf16.mxu0 %v351_v2  ;;  %258 = vmatprep.mubr.msk.f32.mxu0 %vm352_vm0, %v353_v4  ;;  %v108_v7 = vld [vmem:[%s466_s3 + $0x10] sm:$0xff] }
   0x2   :  { %v297_v3 = vpack.c.bf16 %v23_v1, %v22_v0  ;;  %v106_v5 = vld [vmem:[%s466_s3] sm:$0xff]  ;;  %v107_v6 = vld [vmem:[%s466_s3 + $0x8] sm:$0xff]  ;;  %299 = vmatprep.subr.bf16.mxu1 %v351_v2  ;;  %v109_v9 = vld [vmem:[%s466_s3 + $0x18] sm:$0xff]  ;;  %293 = vmatprep.mubr.msk.f32.mxu1 %vm352_vm0, %v353_v4 }
   0x3   :  { %v300_v8 = vpack.c.bf16 %v107_v6, %v106_v5  ;;  %v21_v10 = vld [vmem:[%s463_s0] sm:$0xff]  ;;  %v303_v11 = vpack.c.bf16 %v109_v9, %v108_v7  ;;  %v111_v13 = vld [vmem:[%s466_s3 + $0x28] sm:$0xff] }
   0x4   :  { %298 = vmatpush3.bf16.msra.mxu0 %v297_v3  ;;  %v110_v12 = vld [vmem:[%s466_s3 + $0x20] sm:$0xff] }
   0x5   :  { %301 = vmatpush3.bf16.msra.mxu1 %v300_v8 }
   0x6   :  { %302 = vmatprep.subr.bf16.mxu1 %v351_v2 }
   0x7   :  { %259 = vmatmul.mubr.msk.f32.vlgmr.msra.gmra.mrb[0].mxu0 %vm31_vm1, %v21_v10 }
   0x8   :  { %10 = vsyncpa [#allocation4], 0  ;;  %v306_v14 = vpack.c.bf16 %v111_v13, %v110_v12  ;;  %v112_v15 = vld [vmem:[%s466_s3 + $0x30] sm:$0xff]  ;;  %v113_v16 = vld [vmem:[%s466_s3 + $0x38] sm:$0xff] }
   0x9   :  { %304 = vmatpush3.bf16.msra.mxu1 %v303_v11  ;;  %v309_v17 = vpack.c.bf16 %v113_v16, %v112_v15  ;;  %v114_v18 = vld [vmem:[%s466_s3 + $0x40] sm:$0xff]  ;;  %v115_v19 = vld [vmem:[%s466_s3 + $0x48] sm:$0xff]  ;;  %v116_v21 = vld [vmem:[%s466_s3 + $0x50] sm:$0xff] }
   0xa   :  { %305 = vmatprep.subr.bf16.mxu1 %v351_v2  ;;  %v312_v20 = vpack.c.bf16 %v115_v19, %v114_v18  ;;  %v117_v22 = vld [vmem:[%s466_s3 + $0x58] sm:$0xff]  ;;  %v118_v24 = vld [vmem:[%s466_s3 + $0x60] sm:$0xff]  ;;  %v119_v25 = vld [vmem:[%s466_s3 + $0x68] sm:$0xff] }
   0xb   :  { %v315_v23 = vpack.c.bf16 %v117_v22, %v116_v21  ;;  %v318_v26 = vpack.c.bf16 %v119_v25, %v118_v24  ;;  %v120_v27 = vld [vmem:[%s466_s3 + $0x70] sm:$0xff]  ;;  %v121_v28 = vld [vmem:[%s466_s3 + $0x78] sm:$0xff]  ;;  %v231_v30 = vld [vmem:[%s465_s2] ss:$0 sm:$0xff]  ;;  %s354_s3 = smov [#allocation3]  }
   0xc   :  { %v321_v29 = vpack.c.bf16 %v121_v28, %v120_v27  ;;  %v233_v37 = vld [vmem:[%s467_s4] ss:$0 sm:$0xff]  ;;  %s223_s7 = sshll.u32 %s354_s3, 4  ;;  %s224_s7 = int_to_ptr.vmem [resolvable:$true] %s223_s7 }
   0xd   :  { %307 = vmatpush3.bf16.msra.mxu1 %v306_v14  ;;  %s327_s2 = scalar_lea.vmem %s224_s7, 128  ;;  %p332_p1 = scmp.lt.s32.totalorder %s224_s7, %s224_s7 }
   0xe   :  { %308 = vmatprep.subr.bf16.mxu1 %v351_v2  ;;  %p328_p0 = scmp.ne.s32.totalorder %s224_s7, %s327_s2  ;;  %p333_p2 = scmp.lt.s32.totalorder %s327_s2, %s327_s2 }
  0x10   :  { %p334_p3 = por %p333_p2, %p332_p1 }
  0x11   :  { %310 = vmatpush3.bf16.msra.mxu1 %v309_v17 }
  0x12   :  { %311 = vmatprep.subr.bf16.mxu1 %v351_v2  ;;  %p335_p4 = pnand %p334_p3, %p328_p0 }
  0x15   :  { %313 = vmatpush3.bf16.msra.mxu1 %v312_v20 }
  0x16   :  { %314 = vmatprep.subr.bf16.mxu1 %v351_v2 }
  0x19   :  { %316 = vmatpush3.bf16.msra.mxu1 %v315_v23 }
  0x1a   :  { %317 = vmatprep.subr.bf16.mxu1 %v351_v2 }
  0x1d   :  { %319 = vmatpush3.bf16.msra.mxu1 %v318_v26 }
  0x1e   :  { %320 = vmatprep.subr.bf16.mxu1 %v351_v2 }
  0x21   :  { %322 = vmatpush3.bf16.msra.mxu1 %v321_v29 }
  0xda   :  { %v101_v31 = vpop.f32.mrb[0].mxu0 }
  0xdb   :  { %v102_v32 = vadd.f32 %v231_v30, %v101_v31  ;;  %v260_v33 = vpop.f32.mrb[1].mxu0 }
  0xdd   :  { %v105_v34 = vmax.f32 %v102_v32, 0.0 }
  0xdf   :  { %294 = vmatmul.mubr.f32.vlgmr.msra.gmra.mrb[0].mxu1 %v105_v34 }
 0x1b2   :  { %v188_v35 = vpop.f32.mrb[0].mxu1 }
 0x1b3   :  { %196 = vst.msk [vmem:[#allocation2] sm:$0xff] %vm31_vm1, %v188_v35  ;;  %v295_v36 = vpop.f32.mrb[1].mxu1 }
 0x1ba   :  { %v207_v38 = vld [vmem:[#allocation2] sm:$0xff] }
 0x1bb   :  { %v215_v39 = vadd.f32 %v233_v37, %v207_v38 }
 0x1bd   :  { %216 = vst.msk [vmem:[#allocation3] sm:$0xff] %vm31_vm1, %v215_v39 }
 0x1be   :  { %338 = shalt.err (!%p335_p4)
}
 0x1bf   :  { %s339_s10 = scalar_lea.hbm %s468_s5, 128 }
 0x1c0   :  { %p340_p5 = scmp.ne.s32.totalorder %s468_s5, %s339_s10  ;;  %p343_p6 = scmp.lt.u32.totalorder %s339_s10, %s468_s5 }
 0x1c2   :  { %p345_p7 = pnand %p343_p6, %p340_p5 }
 0x1c4   :  { %348 = shalt.err (!%p345_p7)
}
 0x1c5   :  { %226 = dma.vmem_to_hbm [thread:$0]  %s224_s7, 128, %s468_s5, [#allocation4]  }
 0x1c6   :  { %349 = dma.done.wait [#allocation4], 128  }
 0x1c7   :  { %350 = vsyncadd [#allocation4], 4294967168 }
 0x1c8   :  { %230 = vsyncpa [#allocation4], 1 }

</bundles_post_ra>
